<compile_context>
chip_gen: v5e
topology: v5e:2x2
jax: 0.10.0
libtpu: 0.0.40
codegen_flags: <defaults>
</compile_context>

<pallas_src>
import numpy as np

import jax
import jax.numpy as jnp
from jax import lax
from jax.experimental import pallas as pl
from jax.experimental.pallas import tpu as pltpu


def _easy_sample_kernel(h, d):
    inv_d = 1.0 / float(d)
    hf = float(h)

    def kernel(x1_ref, x2_ref, lab1_ref, lab2_ref, loss_ref):
        x1 = x1_ref[...]            # (h, D) f32   rows [0, h)
        x2 = x2_ref[...]            # (h, D) f32   rows [h, n)
        lab1 = lab1_ref[...]        # (h, 1) i32
        lab2 = lab2_ref[...]        # (1, h) i32

        # ---- per-sample squared norms in their natural layouts (no transposes)
        ones_row = jnp.ones((1, d), dtype=jnp.float32)
        q2_row = lax.dot_general(ones_row, x2 * x2, (((1,), (1,)), ((), ())),
                                 preferred_element_type=jnp.float32)   # (1, h)
        q1_col = jnp.sum(x1 * x1, axis=1, keepdims=True)               # (h, 1)

        # ---- cross inner products on the MXU (bf16 inputs, f32 accumulate).
        # prod only feeds the argmin, never the loss value itself.
        prod = lax.dot_general(x1.astype(jnp.bfloat16),
                               x2.astype(jnp.bfloat16),
                               (((1,), (1,)), ((), ())),
                               preferred_element_type=jnp.float32)     # (h, h)

        # Squared pairwise distance (sqrt never needed: monotone for argmin),
        # clamp (mirrors torch.clamp(min=1e-12), keeps exact-duplicate ties)
        # and same-label mask fused into one select.  Masked-out pairs -> +inf.
        mask = lab1 == lab2                                            # (h, h)
        dm = jnp.where(mask,
                       jnp.maximum(q1_col + q2_row - 2.0 * prod, 1e-12),
                       jnp.inf)                                        # (h, h)

        # ---- closed-form "sum of MSEs to easy sample j" per candidate sample
        s1 = jnp.sum(x1, axis=0, keepdims=True)                        # (1, D)
        s2 = jnp.sum(x2, axis=0, keepdims=True)                        # (1, D)
        c2_row = lax.dot_general(s2, x2, (((1,), (1,)), ((), ())),
                                 preferred_element_type=jnp.float32)   # (1, h)
        c1_col = lax.dot_general(x1, s1, (((1,), (1,)), ((), ())),
                                 preferred_element_type=jnp.float32)   # (h, 1)
        big_q1 = jnp.sum(q1_col)
        big_q2 = jnp.sum(q2_row)
        # v*[j] = sum_k ||x_k - x_j||^2 / D  over the corresponding half
        v2_row = (big_q2 - 2.0 * c2_row + hf * q2_row) * inv_d         # (1, h)
        v1_col = (big_q1 - 2.0 * c1_col + hf * q1_col) * inv_d         # (h, 1)

        # ---- half-1 anchors: nearest same-label column per row
        #      (first index on exact ties, matching the PyTorch break-loop).
        #      All index planes stay int32; sentinel is h (>= any valid index).
        col_idx = lax.broadcasted_iota(jnp.int32, (h, h), 1)
        row_min = jnp.min(dm, axis=1, keepdims=True)                   # (h, 1)
        cand_r = dm == row_min
        first_c = jnp.min(jnp.where(cand_r, col_idx, h),
                          axis=1, keepdims=True)                       # (h, 1) i32
        onehot_r = (col_idx == first_c).astype(jnp.int32)              # (h, h)
        # counts_r[j] = #anchors whose easy sample is column j
        counts_r = jnp.sum(onehot_r, axis=0, keepdims=True)            # (1, h)
        total1 = jnp.sum(counts_r.astype(jnp.float32) * v2_row)

        # ---- half-2 anchors: nearest same-label row per column
        row_idx = lax.broadcasted_iota(jnp.int32, (h, h), 0)
        col_min = jnp.min(dm, axis=0, keepdims=True)                   # (1, h)
        cand_c = dm == col_min
        first_r = jnp.min(jnp.where(cand_c, row_idx, h),
                          axis=0, keepdims=True)                       # (1, h) i32
        onehot_c = (row_idx == first_r).astype(jnp.int32)              # (h, h)
        counts_c = jnp.sum(onehot_c, axis=1, keepdims=True)            # (h, 1)
        total2 = jnp.sum(counts_c.astype(jnp.float32) * v1_col)

        loss_ref[...] = jnp.full((1, 1), total1 + total2, dtype=jnp.float32)

    return kernel


def easy_sample_loss(inputs, label, margin=0.3):
    """Pallas implementation of EasySampleLoss.forward.

    inputs: (n, D) float32, n even; label: (n,) integer ids.
    `margin` is kept for signature parity; forward() never uses it.
    Assumes (as the PyTorch code implicitly does) that every sample has at
    least one same-label sample in the opposite half; otherwise that anchor's
    row/column of dm is all +inf and index 0 is silently picked.
    """
    del margin
    n, d = inputs.shape
    assert n % 2 == 0, "EasySampleLoss needs an even number of samples"
    h = n // 2
    assert h % 8 == 0, "half-batch must be a multiple of 8 (TPU sublane tile)"

    lab = label.astype(jnp.int32)
    lab1_col = lab[:h].reshape(h, 1)      # tiny arrays; wrapper reshape is free
    lab2_row = lab[h:].reshape(1, h)

    # Scoped-VMEM budget: double-buffered f32 halves + bf16 casts + the live
    # (h,h) planes, floored at the 32 MiB default so small cases are untouched
    # and capped well below physical VMEM on every generation.
    vmem_needed = (2 * 2 * h * d * 4      # double-buffered f32 input halves
                   + 2 * h * d * 2        # bf16 matmul operands
                   + 8 * h * h * 4        # live (h,h) f32/i32 planes
                   + (2 << 20))           # small operands / compiler scratch
    vmem_limit = int(min(96 << 20, max(32 << 20, vmem_needed)))

    out = pl.pallas_call(
        _easy_sample_kernel(h, d),
        out_shape=jax.ShapeDtypeStruct((1, 1), jnp.float32),
        grid=(1,),
        in_specs=[
            # Two views of the SAME array: no wrapper slicing / HBM copies.
            pl.BlockSpec((h, d), lambda i: (0, 0)),   # x1 = inputs[:h]
            pl.BlockSpec((h, d), lambda i: (1, 0)),   # x2 = inputs[h:]
            pl.BlockSpec((h, 1), lambda i: (0, 0)),   # labels, column layout
            pl.BlockSpec((1, h), lambda i: (0, 0)),   # labels, row layout
        ],
        out_specs=pl.BlockSpec((1, 1), lambda i: (0, 0)),
        compiler_params=pltpu.CompilerParams(
            dimension_semantics=("arbitrary",),
            vmem_limit_bytes=vmem_limit),
    )(inputs, inputs, lab1_col, lab2_row)

    return out[0, 0]


def _reference_easy_sample_loss(x, label):
    """Literal (loop-for-loop) port of the PyTorch forward, in float64."""
    x = np.asarray(x, dtype=np.float64)
    label = np.asarray(label)
    n, _ = x.shape
    h = n // 2
    sq = (x ** 2).sum(axis=1, keepdims=True)
    dist = sq + sq.T - 2.0 * x @ x.T
    dist = np.sqrt(np.clip(dist, 1e-12, None))
    mask = label[None, :] == label[:, None]
    total = 0.0
    for i in range(n):
        cols = range(h, n) if i < h else range(0, h)
        dist_ap = min(dist[i, j] for j in cols if mask[i, j])
        index = None
        for j in cols:
            if mask[i, j] and dist[i, j] == dist_ap:
                index = j
                break
        easy = x[index]
        loss = 0.0
        for k in cols:
            loss += ((x[k] - easy) ** 2).mean()
        total += loss
    return total


if __name__ == "__main__":
    n, feat_dim = 16, 128            # small: h = 8 anchors per half, D = 128
    h = n // 2

    key = jax.random.PRNGKey(0)
    inputs = jax.random.normal(key, (n, feat_dim), dtype=jnp.float32)
    # 4 identities, each present in both halves (required by the module).
    lab1 = jnp.array([0, 0, 1, 1, 2, 2, 3, 3], dtype=jnp.int32)
    lab2 = jnp.array([2, 3, 0, 1, 3, 2, 1, 0], dtype=jnp.int32)
    label = jnp.concatenate([lab1, lab2])

    loss = easy_sample_loss(inputs, label)
    loss = jax.block_until_ready(loss)

    ref = _reference_easy_sample_loss(np.asarray(inputs), np.asarray(label))
    assert np.isfinite(float(loss)), loss
    assert np.allclose(float(loss), float(ref), rtol=5e-4, atol=1e-2), (
        float(loss), float(ref))

    print("KERNEL_OK")
</pallas_src>

<mosaic_0001>
module attributes {stable_mosaic.version = 11 : i64} {
  func.func @kernel(%arg0: i32, %arg1: memref<8x128xf32, #tpu.memory_space<vmem>>, %arg2: memref<8x128xf32, #tpu.memory_space<vmem>>, %arg3: memref<8x1xi32, #tpu.memory_space<vmem>>, %arg4: memref<1x8xi32, #tpu.memory_space<vmem>>, %arg5: memref<1x1xf32, #tpu.memory_space<vmem>>) attributes {dimension_semantics = [#tpu.dimension_semantics<arbitrary>], iteration_bounds = array<i64: 1>, scalar_prefetch = 0 : i64, scratch_operands = 0 : i64, tpu.core_type = #tpu.core_type<tc>, window_params = [{transform_indices = @transform_0, window_bounds = array<i64: 8, 128>}, {transform_indices = @transform_1, window_bounds = array<i64: 8, 128>}, {pipeline_mode = #tpu.pipeline_mode<synchronous>, transform_indices = @transform_2, window_bounds = array<i64: 8, 1>}, {pipeline_mode = #tpu.pipeline_mode<synchronous>, transform_indices = @transform_3, window_bounds = array<i64: 1, 8>}, {pipeline_mode = #tpu.pipeline_mode<synchronous>, transform_indices = @transform_4, window_bounds = array<i64: 1, 1>}]} {
    %c0 = arith.constant 0 : index
    %c0_0 = arith.constant 0 : index
    %0 = vector.load %arg1[%c0, %c0_0] : memref<8x128xf32, #tpu.memory_space<vmem>>, vector<8x128xf32>
    %c0_1 = arith.constant 0 : index
    %c0_2 = arith.constant 0 : index
    %1 = vector.load %arg2[%c0_1, %c0_2] : memref<8x128xf32, #tpu.memory_space<vmem>>, vector<8x128xf32>
    %c0_3 = arith.constant 0 : index
    %c0_4 = arith.constant 0 : index
    %2 = vector.load %arg3[%c0_3, %c0_4] : memref<8x1xi32, #tpu.memory_space<vmem>>, vector<8x1xi32>
    %c0_5 = arith.constant 0 : index
    %c0_6 = arith.constant 0 : index
    %3 = vector.load %arg4[%c0_5, %c0_6] : memref<1x8xi32, #tpu.memory_space<vmem>>, vector<1x8xi32>
    %cst = arith.constant 1.000000e+00 : f32
    %4 = vector.broadcast %cst : f32 to vector<1x128xf32>
    %5 = arith.mulf %1, %1 : vector<8x128xf32>
    %cst_7 = arith.constant dense<0.000000e+00> : vector<1x8xf32>
    %6 = tpu.matmul %4, %5, %cst_7 {dimension_numbers = #tpu.dot_dimension_numbers<[1], [1], [0], [0], [0, 0, 1, 0], [], []>} : vector<1x128xf32>, vector<8x128xf32>, vector<1x8xf32> -> vector<1x8xf32>
    %7 = arith.mulf %0, %0 : vector<8x128xf32>
    %cst_8 = arith.constant dense<0.000000e+00> : vector<8xf32>
    %8 = vector.multi_reduction <add>, %7, %cst_8 [1] : vector<8x128xf32> to vector<8xf32>
    %9 = vector.shape_cast %8 : vector<8xf32> to vector<8x1xf32>
    %10 = arith.truncf %0 : vector<8x128xf32> to vector<8x128xbf16>
    %11 = arith.truncf %1 : vector<8x128xf32> to vector<8x128xbf16>
    %cst_9 = arith.constant dense<0.000000e+00> : vector<8x8xf32>
    %12 = tpu.matmul %10, %11, %cst_9 {dimension_numbers = #tpu.dot_dimension_numbers<[1], [1], [0], [0], [0, 0, 1, 0], [], []>} : vector<8x128xbf16>, vector<8x128xbf16>, vector<8x8xf32> -> vector<8x8xf32>
    %13 = vector.broadcast %2 : vector<8x1xi32> to vector<8x8xi32>
    %14 = vector.broadcast %3 : vector<1x8xi32> to vector<8x8xi32>
    %15 = arith.cmpi eq, %13, %14 : vector<8x8xi32>
    %16 = vector.broadcast %9 : vector<8x1xf32> to vector<8x8xf32>
    %17 = vector.broadcast %6 : vector<1x8xf32> to vector<8x8xf32>
    %18 = arith.addf %16, %17 : vector<8x8xf32>
    %cst_10 = arith.constant 2.000000e+00 : f32
    %19 = vector.broadcast %cst_10 : f32 to vector<8x8xf32>
    %20 = arith.mulf %19, %12 : vector<8x8xf32>
    %21 = arith.subf %18, %20 : vector<8x8xf32>
    %cst_11 = arith.constant 9.99999996E-13 : f32
    %22 = vector.broadcast %cst_11 : f32 to vector<8x8xf32>
    %23 = arith.maximumf %21, %22 : vector<8x8xf32>
    %cst_12 = arith.constant 0x7F800000 : f32
    %24 = vector.broadcast %cst_12 : f32 to vector<8x8xf32>
    %25 = arith.select %15, %23, %24 : vector<8x8xi1>, vector<8x8xf32>
    %cst_13 = arith.constant dense<0.000000e+00> : vector<128xf32>
    %26 = vector.multi_reduction <add>, %0, %cst_13 [0] : vector<8x128xf32> to vector<128xf32>
    %27 = vector.shape_cast %26 : vector<128xf32> to vector<1x128xf32>
    %cst_14 = arith.constant dense<0.000000e+00> : vector<128xf32>
    %28 = vector.multi_reduction <add>, %1, %cst_14 [0] : vector<8x128xf32> to vector<128xf32>
    %29 = vector.shape_cast %28 : vector<128xf32> to vector<1x128xf32>
    %cst_15 = arith.constant dense<0.000000e+00> : vector<1x8xf32>
    %30 = tpu.matmul %29, %1, %cst_15 {dimension_numbers = #tpu.dot_dimension_numbers<[1], [1], [0], [0], [0, 0, 1, 0], [], []>} : vector<1x128xf32>, vector<8x128xf32>, vector<1x8xf32> -> vector<1x8xf32>
    %cst_16 = arith.constant dense<0.000000e+00> : vector<8x1xf32>
    %31 = tpu.matmul %0, %27, %cst_16 {dimension_numbers = #tpu.dot_dimension_numbers<[1], [1], [0], [0], [0, 0, 1, 0], [], []>} : vector<8x128xf32>, vector<1x128xf32>, vector<8x1xf32> -> vector<8x1xf32>
    %32 = vector.shape_cast %9 : vector<8x1xf32> to vector<1x8x1xf32>
    %cst_17 = arith.constant dense<0.000000e+00> : vector<1xf32>
    %33 = vector.multi_reduction <add>, %32, %cst_17 [1, 2] : vector<1x8x1xf32> to vector<1xf32>
    %34 = vector.shape_cast %33 : vector<1xf32> to vector<1x1x1xf32>
    %35 = vector.extract %34[0, 0, 0] : f32 from vector<1x1x1xf32>
    %36 = vector.shape_cast %6 : vector<1x8xf32> to vector<1x1x8xf32>
    %cst_18 = arith.constant dense<0.000000e+00> : vector<1xf32>
    %37 = vector.multi_reduction <add>, %36, %cst_18 [1, 2] : vector<1x1x8xf32> to vector<1xf32>
    %38 = vector.shape_cast %37 : vector<1xf32> to vector<1x1x1xf32>
    %39 = vector.extract %38[0, 0, 0] : f32 from vector<1x1x1xf32>
    %cst_19 = arith.constant 2.000000e+00 : f32
    %40 = vector.broadcast %cst_19 : f32 to vector<1x8xf32>
    %41 = arith.mulf %40, %30 : vector<1x8xf32>
    %42 = vector.broadcast %39 : f32 to vector<1x8xf32>
    %43 = arith.subf %42, %41 : vector<1x8xf32>
    %cst_20 = arith.constant 8.000000e+00 : f32
    %44 = vector.broadcast %cst_20 : f32 to vector<1x8xf32>
    %45 = arith.mulf %44, %6 : vector<1x8xf32>
    %46 = arith.addf %43, %45 : vector<1x8xf32>
    %cst_21 = arith.constant 7.812500e-03 : f32
    %47 = vector.broadcast %cst_21 : f32 to vector<1x8xf32>
    %48 = arith.mulf %46, %47 : vector<1x8xf32>
    %cst_22 = arith.constant 2.000000e+00 : f32
    %49 = vector.broadcast %cst_22 : f32 to vector<8x1xf32>
    %50 = arith.mulf %49, %31 : vector<8x1xf32>
    %51 = vector.broadcast %35 : f32 to vector<8x1xf32>
    %52 = arith.subf %51, %50 : vector<8x1xf32>
    %cst_23 = arith.constant 8.000000e+00 : f32
    %53 = vector.broadcast %cst_23 : f32 to vector<8x1xf32>
    %54 = arith.mulf %53, %9 : vector<8x1xf32>
    %55 = arith.addf %52, %54 : vector<8x1xf32>
    %cst_24 = arith.constant 7.812500e-03 : f32
    %56 = vector.broadcast %cst_24 : f32 to vector<8x1xf32>
    %57 = arith.mulf %55, %56 : vector<8x1xf32>
    %58 = tpu.iota {dimensions = array<i32: 1>} : vector<8x8xi32>
    %cst_25 = arith.constant dense<0x7F800000> : vector<8xf32>
    %59 = vector.multi_reduction <minimumf>, %25, %cst_25 [1] : vector<8x8xf32> to vector<8xf32>
    %60 = vector.shape_cast %59 : vector<8xf32> to vector<8x1xf32>
    %61 = vector.broadcast %60 : vector<8x1xf32> to vector<8x8xf32>
    %62 = arith.cmpf oeq, %25, %61 : vector<8x8xf32>
    %c8_i32 = arith.constant 8 : i32
    %63 = vector.broadcast %c8_i32 : i32 to vector<8x8xi32>
    %64 = arith.select %62, %58, %63 : vector<8x8xi1>, vector<8x8xi32>
    %cst_26 = arith.constant dense<2147483647> : vector<8xi32>
    %65 = vector.multi_reduction <minsi>, %64, %cst_26 [1] : vector<8x8xi32> to vector<8xi32>
    %66 = vector.shape_cast %65 : vector<8xi32> to vector<8x1xi32>
    %67 = vector.broadcast %66 : vector<8x1xi32> to vector<8x8xi32>
    %68 = arith.cmpi eq, %58, %67 : vector<8x8xi32>
    %69 = arith.extui %68 : vector<8x8xi1> to vector<8x8xi32>
    %cst_27 = arith.constant dense<0> : vector<8xi32>
    %70 = vector.multi_reduction <add>, %69, %cst_27 [0] : vector<8x8xi32> to vector<8xi32>
    %71 = vector.shape_cast %70 : vector<8xi32> to vector<1x8xi32>
    %72 = arith.sitofp %71 : vector<1x8xi32> to vector<1x8xf32>
    %73 = arith.mulf %72, %48 : vector<1x8xf32>
    %74 = vector.shape_cast %73 : vector<1x8xf32> to vector<1x1x8xf32>
    %cst_28 = arith.constant dense<0.000000e+00> : vector<1xf32>
    %75 = vector.multi_reduction <add>, %74, %cst_28 [1, 2] : vector<1x1x8xf32> to vector<1xf32>
    %76 = vector.shape_cast %75 : vector<1xf32> to vector<1x1x1xf32>
    %77 = vector.extract %76[0, 0, 0] : f32 from vector<1x1x1xf32>
    %78 = tpu.iota {dimensions = array<i32: 0>} : vector<8x8xi32>
    %cst_29 = arith.constant dense<0x7F800000> : vector<8xf32>
    %79 = vector.multi_reduction <minimumf>, %25, %cst_29 [0] : vector<8x8xf32> to vector<8xf32>
    %80 = vector.shape_cast %79 : vector<8xf32> to vector<1x8xf32>
    %81 = vector.broadcast %80 : vector<1x8xf32> to vector<8x8xf32>
    %82 = arith.cmpf oeq, %25, %81 : vector<8x8xf32>
    %c8_i32_30 = arith.constant 8 : i32
    %83 = vector.broadcast %c8_i32_30 : i32 to vector<8x8xi32>
    %84 = arith.select %82, %78, %83 : vector<8x8xi1>, vector<8x8xi32>
    %cst_31 = arith.constant dense<2147483647> : vector<8xi32>
    %85 = vector.multi_reduction <minsi>, %84, %cst_31 [0] : vector<8x8xi32> to vector<8xi32>
    %86 = vector.shape_cast %85 : vector<8xi32> to vector<1x8xi32>
    %87 = vector.broadcast %86 : vector<1x8xi32> to vector<8x8xi32>
    %88 = arith.cmpi eq, %78, %87 : vector<8x8xi32>
    %89 = arith.extui %88 : vector<8x8xi1> to vector<8x8xi32>
    %cst_32 = arith.constant dense<0> : vector<8xi32>
    %90 = vector.multi_reduction <add>, %89, %cst_32 [1] : vector<8x8xi32> to vector<8xi32>
    %91 = vector.shape_cast %90 : vector<8xi32> to vector<8x1xi32>
    %92 = arith.sitofp %91 : vector<8x1xi32> to vector<8x1xf32>
    %93 = arith.mulf %92, %57 : vector<8x1xf32>
    %94 = vector.shape_cast %93 : vector<8x1xf32> to vector<1x8x1xf32>
    %cst_33 = arith.constant dense<0.000000e+00> : vector<1xf32>
    %95 = vector.multi_reduction <add>, %94, %cst_33 [1, 2] : vector<1x8x1xf32> to vector<1xf32>
    %96 = vector.shape_cast %95 : vector<1xf32> to vector<1x1x1xf32>
    %97 = vector.extract %96[0, 0, 0] : f32 from vector<1x1x1xf32>
    %98 = arith.addf %77, %97 : f32
    %99 = vector.broadcast %98 : f32 to vector<1x1xf32>
    %c0_34 = arith.constant 0 : index
    %c0_35 = arith.constant 0 : index
    %100 = vector.load %arg5[%c0_34, %c0_35] : memref<1x1xf32, #tpu.memory_space<vmem>>, vector<1x1xf32>
    tpu.vector_store %arg5[%c0_34, %c0_35], %99 {strides = array<i32>} : memref<1x1xf32, #tpu.memory_space<vmem>>, vector<1x1xf32>,
    return
  }
  func.func @transform_0(%arg0: i32) -> (i32, i32) {
    %c0_i32 = arith.constant 0 : i32
    %c0_i32_0 = arith.constant 0 : i32
    %c0_i32_1 = arith.constant 0 : i32
    return %c0_i32, %c0_i32_0 : i32, i32
  }
  func.func @transform_1(%arg0: i32) -> (i32, i32) {
    %c1_i32 = arith.constant 1 : i32
    %c0_i32 = arith.constant 0 : i32
    %c0_i32_0 = arith.constant 0 : i32
    return %c1_i32, %c0_i32 : i32, i32
  }
  func.func @transform_2(%arg0: i32) -> (i32, i32) {
    %c0_i32 = arith.constant 0 : i32
    %c0_i32_0 = arith.constant 0 : i32
    %c0_i32_1 = arith.constant 0 : i32
    return %c0_i32, %c0_i32_0 : i32, i32
  }
  func.func @transform_3(%arg0: i32) -> (i32, i32) {
    %c0_i32 = arith.constant 0 : i32
    %c0_i32_0 = arith.constant 0 : i32
    %c0_i32_1 = arith.constant 0 : i32
    return %c0_i32, %c0_i32_0 : i32, i32
  }
  func.func @transform_4(%arg0: i32) -> (i32, i32) {
    %c0_i32 = arith.constant 0 : i32
    %c0_i32_0 = arith.constant 0 : i32
    %c0_i32_1 = arith.constant 0 : i32
    return %c0_i32, %c0_i32_0 : i32, i32
  }
}

</mosaic_0001>

<bundles_post_ra>
// kernel: tpu_custom_call.1
= control target key start
LH: loop header
LB: loop body
LE: loop exit
PB: predicated region body
PF: predicated region fallthrough
CT: control target
= control target key end

     0   :  { %9 = vsyncpa [#allocation3], 0  ;;  %s453_s0 = inlined_call_operand.hbm [shape: f32[16,128], index: 0, kind: input, shape index: {}]   ;;  %s454_s1 = inlined_call_operand.hbm [shape: f32[16,128], index: 1, kind: input, shape index: {}]   ;;  %s455_s2 = inlined_call_operand.vmem [shape: s32[8,1], index: 2, kind: input, shape index: {}]   ;;  %s456_s3 = inlined_call_operand.vmem [shape: s32[1,8], index: 3, kind: input, shape index: {}]   ;;  %s457_s4 = inlined_call_operand.hbm [shape: f32[1,1], index: 4, kind: output, shape index: {}]  }
   0x1   :  { %10 = vsyncpa [#allocation6], 0 }
   0x2   :  { %11 = vsyncpa [#allocation4], 0  ;;  %s17_s17 = sshll.u32 %s453_s0, 4  ;;  %s377_s18 = smov [#allocation2]   ;;  %s18_s17 = int_to_ptr.hbm [resolvable:$true] %s17_s17 }
   0x3   :  { %s19_s19 = sshll.u32 %s377_s18, 4  ;;  %s27_s22 = scalar_lea.hbm %s454_s1, 8  ;;  %s20_s19 = int_to_ptr.vmem [resolvable:$true] %s19_s19 }
   0x4   :  { %22 = dma.hbm_to_vmem [thread:$0]  %s18_s17, 128, %s20_s19, [#allocation3]  }
   0x5   :  { %s29_s23 = sshll.u32 %s27_s22, 4  ;;  %s378_s24 = smov [#allocation5]   ;;  %s30_s23 = int_to_ptr.hbm [resolvable:$true] %s29_s23 }
   0x6   :  { %s31_s25 = sshll.u32 %s378_s24, 4  ;;  %s32_s25 = int_to_ptr.vmem [resolvable:$true] %s31_s25 }
   0x7   :  { %34 = dma.hbm_to_vmem [thread:$0]  %s30_s23, 128, %s32_s25, [#allocation6]  }
   0x8   :  { %371 = dma.done.wait [#allocation3], 128  }
   0x9   :  { %372 = vsyncadd [#allocation3], 4294967168 }
   0xa   :  { %373 = dma.done.wait [#allocation6], 128  }
   0xb   :  { %374 = vsyncadd [#allocation6], 4294967168  ;;  %v379_v0 = vmov 0   ;;  %v49_v1 = vld [vmem:[#allocation5] sm:$0xff]  ;;  %v414_v2 = vld [vmem:[#allocation2] sm:$0xff]  ;;  %v380_v6 = vmov 1.0   ;;  %v171_v35 = vlaneseq }
   0xc   :  { %297 = vset.pattern.permute.xlu0 %v379_v0  ;;  %v52_v3 = vmul.f32 %v49_v1, %v49_v1  ;;  %v77_v4 = vpack.c.bf16 %v49_v1, %v49_v1  ;;  %v73_v5 = vmul.f32 %v414_v2, %v414_v2  ;;  %129 = vmatpush.xpose.msra.mxu2 %v49_v1  ;;  %v50_v8 = vld [vmem:[%s455_s2] sm:$0xff]  ;;  %v108_v9 = vrot.slane %v49_v1, 4  ;;  %s381_s28 = smov [#allocation7]   ;;  %s273_s7 = sshll.u32 %s457_s4, 4  ;;  %s274_s7 = int_to_ptr.hbm [resolvable:$true] %s273_s7 }
   0xd   :  { %v76_v7 = vpack.c.bf16 %v414_v2, %v414_v2  ;;  %vm148_vm0 = vcmask 57344   ;;  %v298_v18 = vld [vmem:[%s456_s3] ss:$0 sm:$0xff]  ;;  %vm173_vm2 = vcmask 64512   ;;  %vm137_vm3 = vcmask 7168   ;;  %s271_s29 = sshll.u32 %s381_s28, 4  ;;  %s272_s29 = int_to_ptr.vmem [resolvable:$true] %s271_s29 }
   0xe   :  { %68 = vmatpush.xpose.msra.mxu0 %v52_v3  ;;  %85 = vmatpush.bf16.xpose.msra.mxu1 %v77_v4  ;;  %v109_v10 = vadd.f32 %v108_v9, %v49_v1  ;;  %v216_v37 = vshrl.u32 %v171_v35, 7  ;;  %v102_v42 = vrot.slane %v414_v2, 4  ;;  %v172_v48 = vand.u32 127, %v171_v35 }
   0xf   :  { %74 = vadd.xlane.f32.xlu0 %v73_v5  ;;  %vm264_vm12 = vcmask 0  }
  0x10   :  { %v110_v13 = vrot.slane %v109_v10, 2  ;;  %v103_v44 = vadd.f32 %v102_v42, %v414_v2 }
  0x11   :  { %69 = vmatmul.f32.vlgmr.msra.gmra.mxu0 %v380_v6 }
  0x12   :  { %v111_v16 = vadd.f32 %v110_v13, %v109_v10  ;;  %v104_v45 = vrot.slane %v103_v44, 2 }
  0x14   :  { %v112_v19 = vrot.slane %v111_v16, 1  ;;  %v105_v52 = vadd.f32 %v104_v45, %v103_v44 }
  0x15   :  { %86 = vmatmul.bf16.vlgmr.msra.gmra.mxu1 %v76_v7 }
  0x16   :  { %v113_v22 = vadd.f32 %v112_v19, %v111_v16  ;;  %v106_v57 = vrot.slane %v105_v52, 1 }
  0x18   :  { %130 = vmatmul.f32.vlgmr.msra.gmra.mxu2 %v113_v22  ;;  %v107_v62 = vadd.f32 %v106_v57, %v105_v52 }
  0x1a   :  { %v134_v3 = vmul.f32 %v107_v62, %v414_v2 }
  0x23   :  { %92 = vperm.xlu0 %297, %v50_v8  }
  0x82   :  { %v423_v11 = vpop.xlane.xlu0 %74 }
  0x83   :  { %v138_v29 = vsel %vm137_vm3, %v423_v11, 0.0 }
  0x8e   :  { %v425_v12 = vpop.f32.mrf.mxu0 }
  0x8f   :  { %v96_v14 = vperm.slane %v425_v12, 0  ;;  %v149_v15 = vsel %vm148_vm0, %v425_v12, 0.0 }
  0x90   :  { %150 = vadd.xlane.f32.xlu2 %v149_v15 }
  0x91   :  { %v97_v20 = vadd.f32 %v96_v14, %v423_v11 }
  0x92   :  { %v87_v17 = vpop.f32.mrf.mxu1 }
  0x93   :  { %v98_v21 = vmul.f32 2.0, %v87_v17 }
  0x95   :  { %v99_v23 = vsub.f32 %v97_v20, %v98_v21  ;;  %v93_v24 = vpop.permute.xlu0 %92 }
  0x96   :  { %vm95_vm1 = vcmp.eq.s32.totalorder %v93_v24, %v298_v18 }
  0x97   :  { %v100_v25 = vmax.f32 %v99_v23, 1e-12 }
  0x99   :  { %v101_v26 = vsel %vm95_vm1, %v100_v25, inf }
  0x9a   :  { %v89_v27 = vpop.f32.mrf.mxu1  ;;  %v174_v28 = vsel %vm173_vm2, %v101_v26, inf }
  0x9b   :  { %175 = vmin.xlane.f32.xlu1 %v174_v28  ;;  %v217_v30 = vrot.slane %v174_v28, 4 }
  0x9d   :  { %v218_v31 = vmin.f32 %v174_v28, %v217_v30 }
  0x9f   :  { %v219_v32 = vrot.slane %v218_v31, 2 }
  0xa1   :  { %v220_v33 = vmin.f32 %v218_v31, %v219_v32 }
  0xa3   :  { %139 = vadd.xlane.f32.xlu1 %v138_v29  ;;  %v221_v34 = vrot.slane %v220_v33, 1  ;;  %v131_v29 = vpop.f32.mrf.mxu2 }
  0xa5   :  { %v222_v36 = vmin.f32 %v220_v33, %v221_v34  ;;  %v159_v34 = vmul.f32 2.0, %v131_v29 }
  0xa7   :  { %vm223_vm4 = vcmp.eq.f32.partialorder %v101_v26, %v222_v36 }
  0xa8   :  { %v224_v38 = vsel %vm223_vm4, %v216_v37, 8 }
  0xa9   :  { %v225_v39 = vsel %vm173_vm2, %v224_v38, 2147483647  ;;  %v168_v38 = vmul.f32 8.0, %v423_v11 }
  0xaa   :  { %v226_v40 = vrot.slane %v225_v39, 4 }
  0xac   :  { %vm227_vm5 = vcmp.lt.s32.totalorder %v225_v39, %v226_v40 }
  0xad   :  { %v228_v41 = vsel %vm227_vm5, %v225_v39, %v226_v40 }
  0xae   :  { %v229_v43 = vrot.slane %v228_v41, 2 }
  0xb0   :  { %vm230_vm6 = vcmp.lt.s32.totalorder %v228_v41, %v229_v43 }
  0xb1   :  { %v231_v46 = vsel %vm230_vm6, %v228_v41, %v229_v43 }
  0xb2   :  { %v232_v49 = vrot.slane %v231_v46, 1 }
  0xb4   :  { %vm233_vm8 = vcmp.lt.s32.totalorder %v231_v46, %v232_v49 }
  0xb5   :  { %v234_v59 = vsel %vm233_vm8, %v231_v46, %v232_v49 }
  0xb6   :  { %vm235_vm9 = vcmp.eq.s32.totalorder %v216_v37, %v234_v59 }
  0xb7   :  { %v236_v5 = vsel %vm235_vm9, 1, %v379_v0 }
  0xb8   :  { %v237_v8 = vsel %vm173_vm2, %v236_v5, 0 }
  0xb9   :  { %v238_v13 = vand.u32 65535, %v237_v8  ;;  %v239_v20 = vshrl.u32 %v237_v8, 16 }
  0xbb   :  { %v240_v16 = vcvt.s32.f32 %v238_v13  ;;  %v241_v21 = vcvt.s32.f32 %v239_v20 }
 0x103   :  { %v151_v47 = vpop.xlane.xlu2 %150 }
 0x104   :  { %v152_v50 = vrot.slane %v151_v47, 4 }
 0x106   :  { %v153_v55 = vadd.f32 %v152_v50, %v151_v47 }
 0x108   :  { %v154_v60 = vrot.slane %v153_v55, 2 }
 0x10a   :  { %v155_v4 = vadd.f32 %v154_v60, %v153_v55 }
 0x10c   :  { %v156_v9 = vrot.slane %v155_v4, 1 }
 0x10e   :  { %v176_v51 = vpop.xlane.xlu1 %175  ;;  %v157_v15 = vadd.f32 %v156_v9, %v155_v4 }
 0x10f   :  { %vm177_vm7 = vcmp.eq.f32.partialorder %v101_v26, %v176_v51 }
 0x110   :  { %v178_v53 = vsel %vm177_vm7, %v172_v48, 8 }
 0x111   :  { %v179_v54 = vsel %vm173_vm2, %v178_v53, 2147483647 }
 0x112   :  { %v181_v56 = vshra.s32 %v179_v54, 16  ;;  %v180_v17 = vand.u32 65535, %v179_v54 }
 0x114   :  { %v183_v58 = vcvt.s32.f32 %v181_v56  ;;  %v182_v2 = vcvt.s32.f32 %v180_v17 }
 0x116   :  { %184 = vmin.xlane.f32.xlu2 %v183_v58  ;;  %v140_v61 = vpop.xlane.xlu1 %139 }
 0x117   :  { %v141_v63 = vrot.slane %v140_v61, 4 }
 0x119   :  { %v142_v1 = vadd.f32 %v141_v63, %v140_v61 }
 0x11b   :  { %v143_v6 = vrot.slane %v142_v1, 2 }
 0x11d   :  { %v144_v7 = vadd.f32 %v143_v6, %v142_v1 }
 0x11e   :  { %135 = vadd.xlane.f32.xlu2 %v134_v3 }
 0x11f   :  { %v145_v10 = vrot.slane %v144_v7, 1 }
 0x121   :  { %v146_v14 = vadd.f32 %v145_v10, %v144_v7 }
 0x123   :  { %284 = vpush %v146_v14 }
 0x124   :  { %286 = vpush %v157_v15 }
 0x126   :  { %242 = vadd.xlane.f32.xlu2 %v240_v16 }
 0x154   :  { %s285_s2 = spop %284 }
 0x155   :  { %v166_v30 = vstv %s285_s2  ;;  %s287_s3 = spop %286 }
 0x156   :  { %v160_v39 = vstv %s287_s3 }
 0x157   :  { %v161_v45 = vsub.f32 %v160_v39, %v159_v34 }
 0x189   :  { %v185_v18 = vpop.xlane.xlu2 %184 }
 0x18a   :  { %vm186_vm10 = vcmp.eq.f32.partialorder %v183_v58, %v185_v18  ;;  %v191_v22 = vcvt.f32.s32 %v185_v18 }
 0x18b   :  { %v187_v19 = vsel %vm186_vm10, %v182_v2, inf }
 0x18c   :  { %188 = vmin.xlane.f32.xlu1 %v187_v19  ;;  %v192_v25 = vshll.u32 %v191_v22, 16 }
 0x191   :  { %v136_v23 = vpop.xlane.xlu2 %135 }
 0x192   :  { %v165_v27 = vmul.f32 2.0, %v136_v23 }
 0x194   :  { %244 = vadd.xlane.f32.xlu1 %v241_v21  ;;  %v167_v32 = vsub.f32 %v166_v30, %v165_v27 }
 0x196   :  { %v169_v42 = vadd.f32 %v168_v38, %v167_v32 }
 0x198   :  { %v170_v50 = vmul.f32 0.0078125, %v169_v42 }
 0x199   :  { %v243_v35 = vpop.xlane.xlu2 %242 }
 0x19a   :  { %v246_v43 = vcvt.f32.s32 %v243_v35 }
 0x1ff   :  { %v189_v24 = vpop.xlane.xlu1 %188 }
 0x200   :  { %v190_v26 = vcvt.f32.s32 %v189_v24 }
 0x202   :  { %v193_v28 = vadd.s32 %v192_v25, %v190_v26 }
 0x204   :  { %vm194_vm11 = vcmp.eq.s32.totalorder %v172_v48, %v193_v28 }
 0x205   :  { %v195_v31 = vsel %vm194_vm11, 1, %v379_v0  ;;  %v162_v0 = vmul.f32 8.0, %v425_v12 }
 0x206   :  { %v196_v33 = vsel %vm173_vm2, %v195_v31, 0 }
 0x207   :  { %v197_v36 = vrot.slane %v196_v33, 4  ;;  %v245_v37 = vpop.xlane.xlu1 %244  ;;  %v163_v51 = vadd.f32 %v162_v0, %v161_v45 }
 0x208   :  { %v247_v40 = vcvt.f32.s32 %v245_v37 }
 0x209   :  { %v198_v41 = vadd.s32 %v197_v36, %v196_v33  ;;  %v164_v55 = vmul.f32 0.0078125, %v163_v51 }
 0x20a   :  { %v248_v44 = vshll.u32 %v247_v40, 16 }
 0x20b   :  { %v199_v46 = vrot.slane %v198_v41, 2 }
 0x20c   :  { %v249_v47 = vadd.s32 %v248_v44, %v246_v43 }
 0x20d   :  { %v200_v48 = vadd.s32 %v199_v46, %v198_v41 }
 0x20e   :  { %v250_v49 = vcvt.s32.f32 %v249_v47 }
 0x20f   :  { %v201_v52 = vrot.slane %v200_v48, 1 }
 0x210   :  { %v251_v53 = vmul.f32 %v250_v49, %v170_v50 }
 0x211   :  { %v202_v54 = vadd.s32 %v201_v52, %v200_v48 }
 0x212   :  { %v252_v11 = vsel %vm137_vm3, %v251_v53, 0.0 }
 0x213   :  { %253 = vadd.xlane.f32.xlu2 %v252_v11  ;;  %v203_v56 = vcvt.s32.f32 %v202_v54 }
 0x215   :  { %v204_v57 = vmul.f32 %v203_v56, %v164_v55 }
 0x217   :  { %v205_v58 = vsel %vm148_vm0, %v204_v57, 0.0 }
 0x218   :  { %206 = vadd.xlane.f32.xlu1 %v205_v58 }
 0x286   :  { %v254_v59 = vpop.xlane.xlu2 %253 }
 0x287   :  { %v255_v60 = vrot.slane %v254_v59, 4 }
 0x289   :  { %v256_v61 = vadd.f32 %v255_v60, %v254_v59 }
 0x28b   :  { %v257_v12 = vrot.slane %v256_v61, 2  ;;  %v207_v62 = vpop.xlane.xlu1 %206 }
 0x28c   :  { %v208_v63 = vrot.slane %v207_v62, 4 }
 0x28d   :  { %v258_v3 = vadd.f32 %v257_v12, %v256_v61 }
 0x28e   :  { %v209_v1 = vadd.f32 %v208_v63, %v207_v62 }
 0x28f   :  { %v259_v6 = vrot.slane %v258_v3, 1 }
 0x290   :  { %v210_v4 = vrot.slane %v209_v1, 2 }
 0x291   :  { %v260_v9 = vadd.f32 %v259_v6, %v258_v3 }
 0x292   :  { %v211_v5 = vadd.f32 %v210_v4, %v209_v1 }
 0x294   :  { %v212_v7 = vrot.slane %v211_v5, 1 }
 0x296   :  { %v213_v8 = vadd.f32 %v212_v7, %v211_v5 }
 0x298   :  { %288 = vpush %v213_v8 }
 0x299   :  { %290 = vpush %v260_v9 }
 0x2c9   :  { %s289_s30 = spop %288 }
 0x2ca   :  { %s291_s8 = spop %290 }
 0x2cb   :  { %s262_s9 = sadd.f32 %s291_s8, %s289_s30 }
 0x2cd   :  { %v263_v10 = vstv %s262_s9 }
 0x2ce   :  { %265 = vst.msk [vmem:[#allocation7] sm:$0x1] %vm264_vm12, %v263_v10 }
 0x2cf   :  { %276 = dma.vmem_to_hbm [thread:$0]  %s272_s29, 16, %s274_s7, [#allocation4]  }
 0x2d0   :  { %375 = dma.done.wait [#allocation4], 16  }
 0x2d1   :  { %376 = vsyncadd [#allocation4], 4294967280 }
 0x2d2   :  { %281 = vsyncpa [#allocation3], 1 }
 0x2d3   :  { %282 = vsyncpa [#allocation6], 1 }
 0x2d4   :  { %283 = vsyncpa [#allocation4], 1 }

</bundles_post_ra>
